<compile_context>
chip_gen: v5e
topology: v5e:2x2
jax: 0.10.0
libtpu: 0.0.40
codegen_flags: <defaults>
</compile_context>

<pallas_src>
import jax
import jax.numpy as jnp
from jax.experimental import pallas as pl
from jax.experimental.pallas import tpu as pltpu

IMAGE_SIZE = 28 * 28          # 784 (multiple of 8 -> valid sublane extent for w0)
H0 = 100
H1 = 50
NUMBER_OF_LABELS = 10

# Lane-aligned (padded) feature dims for the hidden / output layers.
H0_PAD = 128                  # 100 -> 128
H1_PAD = 128                  # 50  -> 128
OUT_PAD = 128                 # 10  -> 128

NEG_LARGE = -1e30             # folded into padded b2 lanes >= 10


def _round_up(x, m):
    return ((x + m - 1) // m) * m


def mlp_kernel(x_ref, w0_ref, b0_ref, w1_ref, b1_ref, w2_ref, b2_ref, o_ref):
    """One batch tile: three matmuls (bf16 operands, f32 acc) + ReLU + log_softmax."""
    cdt = w0_ref.dtype                                               # matmul operand dtype
    x = x_ref[...].astype(cdt)                                       # (TB, 784)

    h0 = jnp.dot(x, w0_ref[...],
                 preferred_element_type=jnp.float32) + b0_ref[...]
    h0 = jnp.maximum(h0, 0.0)                                        # relu(fc0); dropout(eval)=id

    h1 = jnp.dot(h0.astype(cdt), w1_ref[...],
                 preferred_element_type=jnp.float32) + b1_ref[...]
    h1 = jnp.maximum(h1, 0.0)                                        # relu(fc1); dropout(eval)=id

    logits = jnp.dot(h1.astype(cdt), w2_ref[...],
                     preferred_element_type=jnp.float32) + b2_ref[...]   # (TB, 128)
    # Padded logit lanes already hold ~-1e30 via the padded b2 (w2 pad cols are
    # zero), so no in-kernel mask is needed before the softmax normalizer.

    # Numerically stable log_softmax along dim=1, all in f32 (v5e EUP/VPU have
    # no bf16 path; exp/log land on the EUP slot).
    m = jnp.max(logits, axis=-1, keepdims=True)
    shifted = logits - m
    lse = jnp.log(jnp.sum(jnp.exp(shifted), axis=-1, keepdims=True))
    o_ref[...] = (shifted - lse).astype(o_ref.dtype)


def pad_params(params, weight_dtype=jnp.bfloat16):
    """Zero-pad PyTorch-layout (in, out) weights/biases to lane-aligned shapes.

    Weights default to bfloat16 (MXU operands; f32 accumulation keeps accuracy
    loss negligible).  Biases stay f32 and are added to the f32 accumulator.
    The padded lanes of b2 carry -1e30 so padded logits are masked "for free".
    """
    w0, b0, w1, b1, w2, b2 = params

    def pad_w(w, rows, cols):
        out = jnp.zeros((rows, cols), jnp.float32)
        out = out.at[: w.shape[0], : w.shape[1]].set(w.astype(jnp.float32))
        return out.astype(weight_dtype)

    def pad_b(b, cols, fill=0.0):
        out = jnp.full((1, cols), fill, jnp.float32)
        out = out.at[:, : b.shape[-1]].set(b.reshape(1, -1).astype(jnp.float32))
        return out

    return (
        pad_w(w0, IMAGE_SIZE, H0_PAD), pad_b(b0, H0_PAD),
        pad_w(w1, H0_PAD, H1_PAD), pad_b(b1, H1_PAD),
        pad_w(w2, H1_PAD, OUT_PAD), pad_b(b2, OUT_PAD, fill=NEG_LARGE),
    )


def _choose_batch_tile(B, batch_tile):
    """Pick a batch tile: multiple of 128 rows when possible (full MXU pass on
    v5e's 4x128x128 MXU), multiple of 8 otherwise, and capped so the batch grid
    keeps >= 2 steps (lets the "parallel" axis shard across both v7x cores)."""
    half = -(-B // 2)                       # ceil(B / 2)
    if half >= 128:
        tb = _round_up(half, 128)
    else:
        tb = _round_up(half, 8)
    return max(8, min(tb, batch_tile))


def model_c_forward(x_nchw, padded_params, *, batch_tile=512, full_output=False):
    """ModelC forward (eval mode). x_nchw: (B, 1, 28, 28) -> (B, 10) log-probs.

    full_output=True returns the lane-dense (B, 128) block (real log-probs in
    lanes [0, 10); padded lanes are ~-1e30) so consumers that gather a label
    column can skip the post-kernel strided slice.
    """
    w0p, b0p, w1p, b1p, w2p, b2p = padded_params

    B = x_nchw.shape[0]
    x2d = x_nchw.reshape(B, IMAGE_SIZE).astype(jnp.float32)   # x.view(-1, image_size); no padding copy

    tb = _choose_batch_tile(B, batch_tile)
    grid = (pl.cdiv(B, tb),)                                  # ragged final block is masked by Pallas

    w_bytes = sum(int(a.size) * a.dtype.itemsize
                  for a in (w0p, b0p, w1p, b1p, w2p, b2p))
    cost = pl.CostEstimate(
        flops=2 * B * (IMAGE_SIZE * H0_PAD + H0_PAD * H1_PAD + H1_PAD * OUT_PAD),
        transcendentals=B * (OUT_PAD + 1),                    # 128 exps + 1 log per row
        bytes_accessed=B * IMAGE_SIZE * 4 + B * OUT_PAD * 4 + w_bytes,
    )

    out_padded = pl.pallas_call(
        mlp_kernel,
        out_shape=jax.ShapeDtypeStruct((B, OUT_PAD), jnp.float32),
        grid=grid,
        in_specs=[
            pl.BlockSpec((tb, IMAGE_SIZE), lambda i: (i, 0)),     # x tile (784 == full last dim)
            pl.BlockSpec((IMAGE_SIZE, H0_PAD), lambda i: (0, 0)), # weights: VMEM-resident
            pl.BlockSpec((1, H0_PAD), lambda i: (0, 0)),
            pl.BlockSpec((H0_PAD, H1_PAD), lambda i: (0, 0)),
            pl.BlockSpec((1, H1_PAD), lambda i: (0, 0)),
            pl.BlockSpec((H1_PAD, OUT_PAD), lambda i: (0, 0)),
            pl.BlockSpec((1, OUT_PAD), lambda i: (0, 0)),
        ],
        out_specs=pl.BlockSpec((tb, OUT_PAD), lambda i: (i, 0)),  # lane-dense output
        compiler_params=pltpu.CompilerParams(
            dimension_semantics=("parallel",),                    # megacore on v7x
        ),
        cost_estimate=cost,
    )(x2d, w0p, b0p, w1p, b1p, w2p, b2p)

    if full_output:
        return out_padded
    # Strip the padded logit lanes (layout plumbing; avoid via full_output=True).
    return out_padded[:, :NUMBER_OF_LABELS]


def init_params(key):
    """Deterministic init mirroring nn.Linear (uniform +/- 1/sqrt(fan_in)), layout (in, out)."""
    ks = jax.random.split(key, 6)

    def lin(kw, kb, fan_in, fan_out):
        bound = 1.0 / jnp.sqrt(fan_in)
        w = jax.random.uniform(kw, (fan_in, fan_out), jnp.float32, -bound, bound)
        b = jax.random.uniform(kb, (1, fan_out), jnp.float32, -bound, bound)
        return w, b

    w0, b0 = lin(ks[0], ks[1], IMAGE_SIZE, H0)
    w1, b1 = lin(ks[2], ks[3], H0, H1)
    w2, b2 = lin(ks[4], ks[5], H1, NUMBER_OF_LABELS)
    return (w0, b0, w1, b1, w2, b2)


def _ref_forward(x_nchw, params):
    """Pure-JAX f32 reference of the PyTorch forward (eval mode)."""
    w0, b0, w1, b1, w2, b2 = params
    x = x_nchw.reshape(x_nchw.shape[0], IMAGE_SIZE).astype(jnp.float32)
    h0 = jnp.maximum(x @ w0 + b0, 0.0)
    h1 = jnp.maximum(h0 @ w1 + b1, 0.0)
    logits = h1 @ w2 + b2
    return jax.nn.log_softmax(logits, axis=-1)


if __name__ == "__main__":
    key = jax.random.PRNGKey(0)
    k_x, k_p = jax.random.split(key)

    # Small MNIST-like batch: (B, 1, 28, 28) NCHW.
    B = 16
    x = jax.random.normal(k_x, (B, 1, 28, 28), dtype=jnp.float32)
    params = init_params(k_p)
    padded_params = pad_params(params)            # bf16 matmul operands, f32 biases

    # Default tile selection gives tb=8 -> grid=(2,) at this tiny B, exercising
    # the multi-step "parallel" batch grid; large B would get tb=512.
    out = model_c_forward(x, padded_params)
    out = jax.block_until_ready(out)

    # Sanity: shape, finiteness, rows sum to ~1 in prob space, close to f32 reference.
    assert out.shape == (B, NUMBER_OF_LABELS)
    assert bool(jnp.all(jnp.isfinite(out)))
    row_sums = jnp.sum(jnp.exp(out), axis=1)
    assert bool(jnp.all(jnp.abs(row_sums - 1.0) < 1e-4))
    ref = _ref_forward(x, params)
    assert bool(jnp.max(jnp.abs(out - ref)) < 0.1)   # bf16-operand tolerance

    print("KERNEL_OK")
</pallas_src>

<mosaic_0001>
module attributes {stable_mosaic.version = 11 : i64} {
  func.func @mlp_kernel(%arg0: i32, %arg1: memref<8x784xf32, #tpu.memory_space<vmem>>, %arg2: memref<784x128xbf16, #tpu.memory_space<vmem>>, %arg3: memref<1x128xf32, #tpu.memory_space<vmem>>, %arg4: memref<128x128xbf16, #tpu.memory_space<vmem>>, %arg5: memref<1x128xf32, #tpu.memory_space<vmem>>, %arg6: memref<128x128xbf16, #tpu.memory_space<vmem>>, %arg7: memref<1x128xf32, #tpu.memory_space<vmem>>, %arg8: memref<8x128xf32, #tpu.memory_space<vmem>>) attributes {dimension_semantics = [#tpu.dimension_semantics<parallel>], iteration_bounds = array<i64: 2>, scalar_prefetch = 0 : i64, scratch_operands = 0 : i64, tpu.core_type = #tpu.core_type<tc>, window_params = [{transform_indices = @transform_0, window_bounds = array<i64: 8, 784>}, {pipeline_mode = #tpu.pipeline_mode<synchronous>, transform_indices = @transform_1, window_bounds = array<i64: 784, 128>}, {pipeline_mode = #tpu.pipeline_mode<synchronous>, transform_indices = @transform_2, window_bounds = array<i64: 1, 128>}, {pipeline_mode = #tpu.pipeline_mode<synchronous>, transform_indices = @transform_3, window_bounds = array<i64: 128, 128>}, {pipeline_mode = #tpu.pipeline_mode<synchronous>, transform_indices = @transform_4, window_bounds = array<i64: 1, 128>}, {pipeline_mode = #tpu.pipeline_mode<synchronous>, transform_indices = @transform_5, window_bounds = array<i64: 128, 128>}, {pipeline_mode = #tpu.pipeline_mode<synchronous>, transform_indices = @transform_6, window_bounds = array<i64: 1, 128>}, {transform_indices = @transform_7, window_bounds = array<i64: 8, 128>}]} {
    %c0 = arith.constant 0 : index
    %c0_0 = arith.constant 0 : index
    %0 = vector.load %arg1[%c0, %c0_0] : memref<8x784xf32, #tpu.memory_space<vmem>>, vector<8x784xf32>
    %1 = arith.truncf %0 : vector<8x784xf32> to vector<8x784xbf16>
    %c0_1 = arith.constant 0 : index
    %c0_2 = arith.constant 0 : index
    %2 = vector.load %arg2[%c0_1, %c0_2] : memref<784x128xbf16, #tpu.memory_space<vmem>>, vector<784x128xbf16>
    %cst = arith.constant dense<0.000000e+00> : vector<8x128xf32>
    %3 = tpu.matmul %1, %2, %cst {dimension_numbers = #tpu.dot_dimension_numbers<[1], [0], [0], [1], [0, 0, 1, 1], [], []>} : vector<8x784xbf16>, vector<784x128xbf16>, vector<8x128xf32> -> vector<8x128xf32>
    %c0_3 = arith.constant 0 : index
    %c0_4 = arith.constant 0 : index
    %4 = vector.load %arg3[%c0_3, %c0_4] : memref<1x128xf32, #tpu.memory_space<vmem>>, vector<1x128xf32>
    %5 = vector.broadcast %4 : vector<1x128xf32> to vector<8x128xf32>
    %6 = arith.addf %3, %5 : vector<8x128xf32>
    %cst_5 = arith.constant 0.000000e+00 : f32
    %7 = vector.broadcast %cst_5 : f32 to vector<8x128xf32>
    %8 = arith.maximumf %6, %7 : vector<8x128xf32>
    %9 = arith.truncf %8 : vector<8x128xf32> to vector<8x128xbf16>
    %c0_6 = arith.constant 0 : index
    %c0_7 = arith.constant 0 : index
    %10 = vector.load %arg4[%c0_6, %c0_7] : memref<128x128xbf16, #tpu.memory_space<vmem>>, vector<128x128xbf16>
    %cst_8 = arith.constant dense<0.000000e+00> : vector<8x128xf32>
    %11 = tpu.matmul %9, %10, %cst_8 {dimension_numbers = #tpu.dot_dimension_numbers<[1], [0], [0], [1], [0, 0, 1, 1], [], []>} : vector<8x128xbf16>, vector<128x128xbf16>, vector<8x128xf32> -> vector<8x128xf32>
    %c0_9 = arith.constant 0 : index
    %c0_10 = arith.constant 0 : index
    %12 = vector.load %arg5[%c0_9, %c0_10] : memref<1x128xf32, #tpu.memory_space<vmem>>, vector<1x128xf32>
    %13 = vector.broadcast %12 : vector<1x128xf32> to vector<8x128xf32>
    %14 = arith.addf %11, %13 : vector<8x128xf32>
    %cst_11 = arith.constant 0.000000e+00 : f32
    %15 = vector.broadcast %cst_11 : f32 to vector<8x128xf32>
    %16 = arith.maximumf %14, %15 : vector<8x128xf32>
    %17 = arith.truncf %16 : vector<8x128xf32> to vector<8x128xbf16>
    %c0_12 = arith.constant 0 : index
    %c0_13 = arith.constant 0 : index
    %18 = vector.load %arg6[%c0_12, %c0_13] : memref<128x128xbf16, #tpu.memory_space<vmem>>, vector<128x128xbf16>
    %cst_14 = arith.constant dense<0.000000e+00> : vector<8x128xf32>
    %19 = tpu.matmul %17, %18, %cst_14 {dimension_numbers = #tpu.dot_dimension_numbers<[1], [0], [0], [1], [0, 0, 1, 1], [], []>} : vector<8x128xbf16>, vector<128x128xbf16>, vector<8x128xf32> -> vector<8x128xf32>
    %c0_15 = arith.constant 0 : index
    %c0_16 = arith.constant 0 : index
    %20 = vector.load %arg7[%c0_15, %c0_16] : memref<1x128xf32, #tpu.memory_space<vmem>>, vector<1x128xf32>
    %21 = vector.broadcast %20 : vector<1x128xf32> to vector<8x128xf32>
    %22 = arith.addf %19, %21 : vector<8x128xf32>
    %cst_17 = arith.constant dense<0xFF800000> : vector<8xf32>
    %23 = vector.multi_reduction <maximumf>, %22, %cst_17 [1] : vector<8x128xf32> to vector<8xf32>
    %24 = vector.shape_cast %23 : vector<8xf32> to vector<8x1xf32>
    %25 = vector.broadcast %24 : vector<8x1xf32> to vector<8x128xf32>
    %26 = arith.subf %22, %25 : vector<8x128xf32>
    %27 = math.exp %26 : vector<8x128xf32>
    %cst_18 = arith.constant dense<0.000000e+00> : vector<8xf32>
    %28 = vector.multi_reduction <add>, %27, %cst_18 [1] : vector<8x128xf32> to vector<8xf32>
    %29 = vector.shape_cast %28 : vector<8xf32> to vector<8x1xf32>
    %30 = math.log %29 : vector<8x1xf32>
    %31 = vector.broadcast %30 : vector<8x1xf32> to vector<8x128xf32>
    %32 = arith.subf %26, %31 : vector<8x128xf32>
    %c0_19 = arith.constant 0 : index
    %c0_20 = arith.constant 0 : index
    %33 = vector.load %arg8[%c0_19, %c0_20] : memref<8x128xf32, #tpu.memory_space<vmem>>, vector<8x128xf32>
    tpu.vector_store %arg8[%c0_19, %c0_20], %32 {strides = array<i32>} : memref<8x128xf32, #tpu.memory_space<vmem>>, vector<8x128xf32>,
    return
  }
  func.func @transform_0(%arg0: i32) -> (i32, i32) {
    %c0_i32 = arith.constant 0 : i32
    %c0_i32_0 = arith.constant 0 : i32
    return %arg0, %c0_i32 : i32, i32
  }
  func.func @transform_1(%arg0: i32) -> (i32, i32) {
    %c0_i32 = arith.constant 0 : i32
    %c0_i32_0 = arith.constant 0 : i32
    %c0_i32_1 = arith.constant 0 : i32
    return %c0_i32, %c0_i32_0 : i32, i32
  }
  func.func @transform_2(%arg0: i32) -> (i32, i32) {
    %c0_i32 = arith.constant 0 : i32
    %c0_i32_0 = arith.constant 0 : i32
    %c0_i32_1 = arith.constant 0 : i32
    return %c0_i32, %c0_i32_0 : i32, i32
  }
  func.func @transform_3(%arg0: i32) -> (i32, i32) {
    %c0_i32 = arith.constant 0 : i32
    %c0_i32_0 = arith.constant 0 : i32
    %c0_i32_1 = arith.constant 0 : i32
    return %c0_i32, %c0_i32_0 : i32, i32
  }
  func.func @transform_4(%arg0: i32) -> (i32, i32) {
    %c0_i32 = arith.constant 0 : i32
    %c0_i32_0 = arith.constant 0 : i32
    %c0_i32_1 = arith.constant 0 : i32
    return %c0_i32, %c0_i32_0 : i32, i32
  }
  func.func @transform_5(%arg0: i32) -> (i32, i32) {
    %c0_i32 = arith.constant 0 : i32
    %c0_i32_0 = arith.constant 0 : i32
    %c0_i32_1 = arith.constant 0 : i32
    return %c0_i32, %c0_i32_0 : i32, i32
  }
  func.func @transform_6(%arg0: i32) -> (i32, i32) {
    %c0_i32 = arith.constant 0 : i32
    %c0_i32_0 = arith.constant 0 : i32
    %c0_i32_1 = arith.constant 0 : i32
    return %c0_i32, %c0_i32_0 : i32, i32
  }
  func.func @transform_7(%arg0: i32) -> (i32, i32) {
    %c0_i32 = arith.constant 0 : i32
    %c0_i32_0 = arith.constant 0 : i32
    return %arg0, %c0_i32 : i32, i32
  }
}

</mosaic_0001>

<bundles_post_ra>
// kernel: tpu_custom_call.1
= control target key start
LH: loop header
LB: loop body
LE: loop exit
PB: predicated region body
PF: predicated region fallthrough
CT: control target
= control target key end

     0   :  { %s1992_s0 = inlined_call_operand.hbm [shape: f32[16,784], index: 0, kind: input, shape index: {}]   ;;  %s1993_s1 = inlined_call_operand.hbm [shape: bf16[784,128], index: 1, kind: input, shape index: {}]   ;;  %s1994_s2 = inlined_call_operand.vmem [shape: f32[1,128], index: 2, kind: input, shape index: {}]   ;;  %s1995_s3 = inlined_call_operand.hbm [shape: bf16[128,128], index: 3, kind: input, shape index: {}]   ;;  %s1996_s4 = inlined_call_operand.vmem [shape: f32[1,128], index: 4, kind: input, shape index: {}]   ;;  %s1997_s5 = inlined_call_operand.hbm [shape: bf16[128,128], index: 5, kind: input, shape index: {}]   ;;  %s1998_s6 = inlined_call_operand.vmem [shape: f32[1,128], index: 6, kind: input, shape index: {}]   ;;  %s1999_s7 = inlined_call_operand.hbm [shape: f32[16,128], index: 7, kind: output, shape index: {}]  }
   0x1   :  { %2000 = sst [smem:[#allocation16_spill]] %s1993_s1 }
   0x2   :  { %2001 = sst [smem:[#allocation17_spill]] %s1995_s3 }
   0x3   :  { %2002 = sst [smem:[#allocation18_spill]] %s1997_s5 }
   0x4   :  { %12 = vsyncpa [#allocation3], 0 }
   0x5   :  { %14 = vsyncpa [#allocation3 + $0x1], 0 }
   0x6   :  { %15 = vsyncpa [#allocation6], 0 }
   0x7   :  { %16 = vsyncpa [#allocation9], 0 }
   0x8   :  { %17 = vsyncpa [#allocation4], 0 }
   0x9   :  { %19 = vsyncpa [#allocation4 + $0x1], 0  ;;  %s1817_s24 = smov 0   ;;  %s1819_s25 = smov 0  }
   0xa   :  { %s1821_s26 = smov 0   ;;  %s1823_s27 = smov 0  }
   0xb LB: > { %s2003_s1 = sld [smem:[#allocation16_spill]]  ;;  %s1841_s8 = sadd.s32 4294967295, %s1770_s27   ;;  %s1770_s27 = sphi %s1823_s27, %s2018_s27   ;;  %s1766_s26 = sphi %s1821_s26, %s2017_s26   ;;  %s1762_s25 = sphi %s1819_s25, %s2016_s25   ;;  %s1758_s24 = sphi %s1817_s24, %s2015_s24  }
   0xc   : > { %p1146_p0 = scmp.ge.s32.totalorder %s1770_s27, 1  ;;  %p46_p1 = scmp.eq.s32.totalorder %s1841_s8, 0 }
   0xd   : > { %p208_p2 = scmp.lt.s32.totalorder %s1770_s27, 3  ;;  %s1772_s10 = smov [#allocation5]  }
   0xe   : > { %s221_s11 = sshll.u32 %s1772_s10, 4  ;;  %s2005_s3 = sld [smem:[#allocation17_spill]]  ;;  %s222_s11 = int_to_ptr.vmem [resolvable:$true] %s221_s11 }
   0xf   : > { %p1846_p3 = pnand %p1146_p0, %p208_p2  ;;  %s2007_s5 = sld [smem:[#allocation18_spill]] }
  0x10   : > { %s1773_s19 = smov [#allocation7]   ;;  %s1774_s21 = smov 64  }
  0x11   : > { %s219_s30 = sshll.u32 %s2003_s1, 4  ;;  %p1506_p4 = pneg %p1846_p3  ;;  %s220_s30 = int_to_ptr.hbm [resolvable:$true] %s219_s30 }
  0x12   : > { %s238_s20 = sshll.u32 %s1773_s19, 4  ;;  %s1775_s22 = smov 4   ;;  %s239_s20 = int_to_ptr.vmem [resolvable:$true] %s238_s20 }
  0x13   : > { %p1858_p6 = pnand %p1506_p4, %p46_p1  ;;  %s1776_s23 = smov [#allocation8]  }
  0x14   : > { %s236_s14 = sshll.u32 %s2005_s3, 4  ;;  %s255_s28 = sshll.u32 %s1776_s23, 4  ;;  %s237_s14 = int_to_ptr.hbm [resolvable:$true] %s236_s14  ;;  %s256_s28 = int_to_ptr.vmem [resolvable:$true] %s255_s28 }
  0x15   : > { %s253_s18 = sshll.u32 %s2007_s5, 4  ;;  %s1145_s29 = sadd.s32 4294967294, %s1770_s27   ;;  %s254_s18 = int_to_ptr.hbm [resolvable:$true] %s253_s18 }
  0x16   : > { %1509 = dma.hbm_to_vmem [thread:$0]  (!%p1858_p6), %s220_s30, 6272, %s222_s11, [#allocation6], %s1774_s21, %s1774_s21, %s1775_s22  }
  0x17   : > { %1512 = dma.hbm_to_vmem [thread:$0]  (!%p1858_p6), %s237_s14, 1024, %s239_s20, [#allocation6], %s1774_s21, %s1774_s21, %s1775_s22  }
  0x18   : > { %1515 = dma.hbm_to_vmem [thread:$0]  (!%p1858_p6), %s254_s18, 1024, %s256_s28, [#allocation9], %s1774_s21, %s1774_s21, %s1775_s22  }
  0x19   : > { %s1873_s10 = sadd.s32 1, %s1770_s27   ;;  %s32_s12 = sadd.s32 1, %s1766_s26 }
  0x1a   : > { %s29_s30 = ssub.s32 %s1770_s27, %s1873_s10  ;;  %p39_p7 = scmp.ne.s32.totalorder %s1766_s26, %s1762_s25 }
  0x1b   : > { %p30_p8 = scmp.eq.s32.totalorder %s29_s30, 0  ;;  %p40_p9 = scmp.eq.s32.totalorder %s1770_s27, 0 }
  0x1c   : > { %p45_p10 = scmp.ne.s32.totalorder %s1762_s25, %s1758_s24  ;;  %p195_p11 = scmp.eq.s32.totalorder %s1841_s8, 1 }
  0x1d   : > { %s1885_s11 = scalar_select %p30_p8, %s1766_s26, %s32_s12  }
  0x1e   : > { %p41_p12 = por %p40_p9, %p39_p7  ;;  %p1889_p13 = por %p46_p1, %p45_p10 }
  0x1f   : > { %2008 = sst [smem:[#allocation15_spill]] %s1885_s11  ;;  %p1893_p0 = por %p195_p11, %p39_p7 }
  0x20   : > { %p201_p2 = scmp.eq.s32.totalorder %s1145_s29, 1  ;;  %p1527_p4 = scmp.lt.s32.totalorder %s1770_s27, 2 }
  0x21   : > { %s272_s15 = sand.u32 1, %s1766_s26   ;;  %s1488_s19 = smul.u32 56, %s1770_s27 }
  0x22   : > { %p1899_p6 = por %p201_p2, %p45_p10  ;;  %s1487_s17 = smul.u32 56, %s272_s15 }
  0x23   : > { %p1903_p8 = pnand %p1527_p4, %p41_p12  ;;  %s281_s22 = scalar_lea.hbm %s1992_s0, %s1488_s19 }
  0x24   : > { %s276_s23 = scalar_lea.vmem [#allocation2], %s1487_s17  ;;  %s283_s29 = sshll.u32 %s281_s22, 4  ;;  %s284_s29 = int_to_ptr.hbm [resolvable:$true] %s283_s29 }
  0x25   : > { %s285_s28 = sshll.u32 %s276_s23, 4  ;;  %s273_s12 = scalar_lea.sflag [#allocation3], %s272_s15  ;;  %s286_s28 = int_to_ptr.vmem [resolvable:$true] %s285_s28 }
  0x26   : > { %s1666_s30 = sshra.s32 %s284_s29, 4  ;;  %p1670_p9 = pneg %p1903_p8  ;;  %s1667_s30 = int_to_ptr.hbm [resolvable:$true] %s1666_s30 }
  0x27   : > { %s1668_s1 = scalar_lea.hbm %s1667_s30, 56  ;;  %s1673_s11 = scalar_lea.hbm %s1992_s0, 112 }
  0x28   : > { %p1669_p7 = scmp.ne.s32.totalorder %s1667_s30, %s1668_s1  ;;  %p1674_p12 = scmp.lt.s32.totalorder %s1667_s30, %s1992_s0 }
  0x29   : > { %p1675_p2 = scmp.lt.s32.totalorder %s1673_s11, %s1668_s1 }
  0x2a   : > { %p1671_p10 = pnand %p1670_p9, %p1669_p7 }
  0x2b   : > { %p1676_p4 = por %p1675_p2, %p1674_p12 }
  0x2c   : > { %p1672_p11 = pneg %p1671_p10 }
  0x2e   : > { %p1677_p5 = pnand %p1676_p4, %p1672_p11 }
  0x30   : > { %1680 = shalt.err (!%p1677_p5)
}
  0x31   : > { %1519 = dma.hbm_to_vmem [thread:$0]  (!%p1903_p8), %s284_s29, 896, %s286_s28, %s273_s12  }
  0x32   : > { %294 = sbr.rel (%p1846_p3) target bundleno = 789 (0x315), region = 48  ;;  %s1924_s15 = sand.u32 (!%p1846_p3), 1, %s1762_s25  }
  0x33   : > { %s1489_s3 = smul.u32 (!%p1846_p3), 56, %s1924_s15  ;;  %s297_s5 = scalar_lea.sflag (!%p1846_p3), [#allocation3], %s1924_s15 }
  0x35   : > { %s1928_s17 = scalar_lea.vmem (!%p1846_p3), [#allocation2], %s1489_s3 }
  0x37   : > { %1741 = dma.done.wait (%p1889_p13), %s297_s5, 896  }
  0x38   : > { %1743 = vsyncadd (%p1889_p13), %s297_s5, 4294966400 }
  0x39   : > { %1745 = dma.done.wait (%p46_p1), [#allocation6], 7296  }
  0x3a   : > { %1747 = vsyncadd (%p46_p1), [#allocation6], 4294960000 }
  0x3b   : > { %1749 = dma.done.wait (%p46_p1), [#allocation9], 1024  }
  0x3c   : > { %1751 = vsyncadd (%p46_p1), [#allocation9], 4294966272  ;;  %v1429_v0 = vld [vmem:[#allocation5 + $0x38] sm:$0xff]  ;;  %v1428_v3 = vld [vmem:[#allocation5 + $0x30] sm:$0xff]  ;;  %vm758_vm0 = vcmask 130048   ;;  %s1156_s22 = sshll.u32 %s1924_s15, 3 }
  0x3d   : > { %v1437_v1 = vld [vmem:[#allocation5 + $0x78] sm:$0xff]  ;;  %762 = vmatpush.bf16.msra.mxu0 %v1429_v0  ;;  %v1436_v4 = vld [vmem:[#allocation5 + $0x70] sm:$0xff]  ;;  %v1427_v8 = vld [vmem:[#allocation5 + $0x28] sm:$0xff]  ;;  %s1419_s23 = sshll.u32 %s1841_s8, 3  ;;  %s346_s30 = scalar_lea.vmem [#allocation10], %s1156_s22 }
  0x3e   : > { %v1445_v2 = vld [vmem:[#allocation5 + $0xb8] sm:$0xff]  ;;  %775 = vmatpush.bf16.msra.mxu1 %v1437_v1  ;;  %v1444_v5 = vld [vmem:[#allocation5 + $0xb0] sm:$0xff]  ;;  %v1435_v9 = vld [vmem:[#allocation5 + $0x68] sm:$0xff]  ;;  %s1041_s12 = scalar_lea.hbm %s1999_s7, %s1419_s23  ;;  %s1043_s20 = sshll.u32 %s346_s30, 4  ;;  %s1044_s20 = int_to_ptr.vmem [resolvable:$true] %s1043_s20 }
  0x3f   : > { %788 = vmatpush.bf16.msra.mxu2 %v1445_v2  ;;  %v1453_v6 = vld [vmem:[#allocation5 + $0xf8] sm:$0xff]  ;;  %v1452_v7 = vld [vmem:[#allocation5 + $0xf0] sm:$0xff]  ;;  %v1443_v10 = vld [vmem:[#allocation5 + $0xa8] sm:$0xff]  ;;  %s1045_s19 = sshll.u32 %s1041_s12, 4  ;;  %s1031_s3 = scalar_lea.sflag [#allocation4], %s1924_s15  ;;  %s1046_s19 = int_to_ptr.hbm [resolvable:$true] %s1045_s19 }
  0x40   : > { %801 = vmatpush.bf16.msra.mxu3 %v1453_v6  ;;  %v1451_v11 = vld [vmem:[#allocation5 + $0xe8] sm:$0xff]  ;;  %v1426_v12 = vld [vmem:[#allocation5 + $0x20] sm:$0xff]  ;;  %v1425_v16 = vld [vmem:[#allocation5 + $0x18] sm:$0xff]  ;;  %s1710_s5 = sshra.s32 %s1046_s19, 4  ;;  %s1716_s9 = scalar_lea.hbm %s1999_s7, 16  ;;  %s1711_s5 = int_to_ptr.hbm [resolvable:$true] %s1710_s5 }
  0x41   : > { %763 = vmatpush.bf16.msra.mxu0 %v1428_v3  ;;  %v1434_v13 = vld [vmem:[#allocation5 + $0x60] sm:$0xff]  ;;  %v1433_v17 = vld [vmem:[#allocation5 + $0x58] sm:$0xff]  ;;  %v1424_v20 = vld [vmem:[#allocation5 + $0x10] sm:$0xff]  ;;  %p1717_p13 = scmp.lt.s32.totalorder %s1711_s5, %s1999_s7 }
  0x42   : > { %776 = vmatpush.bf16.msra.mxu1 %v1436_v4  ;;  %v1442_v14 = vld [vmem:[#allocation5 + $0xa0] sm:$0xff]  ;;  %v1441_v18 = vld [vmem:[#allocation5 + $0x98] sm:$0xff]  ;;  %v1432_v21 = vld [vmem:[#allocation5 + $0x50] sm:$0xff] }
  0x43   : > { %789 = vmatpush.bf16.msra.mxu2 %v1444_v5  ;;  %v1450_v15 = vld [vmem:[#allocation5 + $0xe0] sm:$0xff]  ;;  %v1449_v19 = vld [vmem:[#allocation5 + $0xd8] sm:$0xff]  ;;  %v1440_v22 = vld [vmem:[#allocation5 + $0x90] sm:$0xff] }
  0x44   : > { %802 = vmatpush.bf16.msra.mxu3 %v1452_v7  ;;  %v1448_v23 = vld [vmem:[#allocation5 + $0xd0] sm:$0xff]  ;;  %v1423_v24 = vld [vmem:[#allocation5 + $0x8] sm:$0xff]  ;;  %v1422_v27 = vld [vmem:[#allocation5] sm:$0xff] }
  0x45   : > { %764 = vmatpush.bf16.msra.mxu0 %v1427_v8  ;;  %v1431_v25 = vld [vmem:[#allocation5 + $0x48] sm:$0xff]  ;;  %v1430_v29 = vld [vmem:[#allocation5 + $0x40] sm:$0xff]  ;;  %v349_v31 = vld [vmem:[%s1928_s17 + $0x8] sm:$0xff] }
  0x46   : > { %777 = vmatpush.bf16.msra.mxu1 %v1435_v9  ;;  %v1439_v26 = vld [vmem:[#allocation5 + $0x88] sm:$0xff]  ;;  %v1461_v32 = vld [vmem:[#allocation5 + $0x138] sm:$0xff]  ;;  %v1438_v34 = vld [vmem:[#allocation5 + $0x80] sm:$0xff]  ;;  %v356_v37 = vpack.c.bf16 %v349_v31, %v349_v31 }
  0x47   : > { %790 = vmatpush.bf16.msra.mxu2 %v1443_v10  ;;  %v1447_v28 = vld [vmem:[#allocation5 + $0xc8] sm:$0xff]  ;;  %v1469_v33 = vld [vmem:[#allocation5 + $0x178] sm:$0xff]  ;;  %v1446_v38 = vld [vmem:[#allocation5 + $0xc0] sm:$0xff] }
  0x48   : > { %803 = vmatpush.bf16.msra.mxu3 %v1451_v11  ;;  %v348_v30 = vld [vmem:[%s1928_s17] sm:$0xff]  ;;  %v350_v35 = vld [vmem:[%s1928_s17 + $0x10] sm:$0xff]  ;;  %v351_v40 = vld [vmem:[%s1928_s17 + $0x18] sm:$0xff] }
  0x49   : > { %765 = vmatpush.bf16.msra.mxu0 %v1426_v12  ;;  %v355_v36 = vpack.c.bf16 %v348_v30, %v348_v30  ;;  %v1470_v39 = vld [vmem:[#allocation5 + $0x180] sm:$0xff]  ;;  %v1460_v41 = vld [vmem:[#allocation5 + $0x130] sm:$0xff]  ;;  %v357_v43 = vpack.c.bf16 %v350_v35, %v350_v35  ;;  %v358_v44 = vpack.c.bf16 %v351_v40, %v351_v40  ;;  %v1459_v45 = vld [vmem:[#allocation5 + $0x128] sm:$0xff] }
  0x4a   : > { %778 = vmatpush.bf16.msra.mxu1 %v1434_v13  ;;  %v1468_v42 = vld [vmem:[#allocation5 + $0x170] sm:$0xff]  ;;  %v1467_v46 = vld [vmem:[#allocation5 + $0x168] sm:$0xff]  ;;  %v1458_v47 = vld [vmem:[#allocation5 + $0x120] sm:$0xff] }
  0x4b   : > { %791 = vmatpush.bf16.msra.mxu2 %v1442_v14  ;;  %v1466_v48 = vld [vmem:[#allocation5 + $0x160] sm:$0xff]  ;;  %v1457_v49 = vld [vmem:[#allocation5 + $0x118] sm:$0xff]  ;;  %v1456_v52 = vld [vmem:[#allocation5 + $0x110] sm:$0xff] }
  0x4c   : > { %804 = vmatpush.bf16.msra.mxu3 %v1450_v15  ;;  %v1465_v50 = vld [vmem:[#allocation5 + $0x158] sm:$0xff]  ;;  %v1464_v53 = vld [vmem:[#allocation5 + $0x150] sm:$0xff]  ;;  %v1455_v55 = vld [vmem:[#allocation5 + $0x108] sm:$0xff] }
  0x4d   : > { %766 = vmatpush.bf16.msra.mxu0 %v1425_v16  ;;  %v354_v51 = vld [vmem:[%s1928_s17 + $0x30] sm:$0xff]  ;;  %v1463_v56 = vld [vmem:[#allocation5 + $0x148] sm:$0xff]  ;;  %v353_v60 = vld [vmem:[%s1928_s17 + $0x28] sm:$0xff] }
  0x4e   : > { %779 = vmatpush.bf16.msra.mxu1 %v1433_v17  ;;  %v361_v54 = vpack.c.bf16 %v354_v51, %v354_v51  ;;  %v1454_v57 = vld [vmem:[#allocation5 + $0x100] sm:$0xff]  ;;  %v352_v59 = vld [vmem:[%s1928_s17 + $0x20] sm:$0xff]  ;;  %v360_v62 = vpack.c.bf16 %v353_v60, %v353_v60  ;;  %v1477_v0 = vld [vmem:[#allocation7 + $0x30] sm:$0xff]  ;;  %s1712_s17 = scalar_lea.hbm %s1711_s5, 8 }
  0x4f   : > { %792 = vmatpush.bf16.msra.mxu2 %v1441_v18  ;;  %v1462_v58 = vld [vmem:[#allocation5 + $0x140] sm:$0xff]  ;;  %v359_v61 = vpack.c.bf16 %v352_v59, %v352_v59  ;;  %v1476_v1 = vld [vmem:[#allocation7 + $0x28] sm:$0xff]  ;;  %v1475_v2 = vld [vmem:[#allocation7 + $0x20] sm:$0xff]  ;;  %p1713_p1 = scmp.ne.s32.totalorder %s1711_s5, %s1712_s17  ;;  %p1718_p8 = scmp.lt.s32.totalorder %s1716_s9, %s1712_s17 }
  0x50   : > { %805 = vmatpush.bf16.msra.mxu3 %v1449_v19  ;;  %v1478_v63 = vld [vmem:[#allocation7 + $0x38] sm:$0xff]  ;;  %v1473_v4 = vld [vmem:[#allocation7 + $0x10] sm:$0xff]  ;;  %v1472_v5 = vld [vmem:[#allocation7 + $0x8] sm:$0xff] }
  0x51   : > { %767 = vmatpush.bf16.msra.mxu0 %v1424_v20  ;;  %v1474_v3 = vld [vmem:[#allocation7 + $0x18] sm:$0xff]  ;;  %v1471_v8 = vld [vmem:[#allocation7] sm:$0xff]  ;;  %v1485_v14 = vld [vmem:[#allocation8 + $0x30] sm:$0xff]  ;;  %p1714_p3 = pnand %p1713_p1, %p1893_p0  ;;  %p1719_p7 = por %p1718_p8, %p1717_p13 }
  0x52   : > { %780 = vmatpush.bf16.msra.mxu1 %v1432_v21  ;;  %v1486_v11 = vld [vmem:[#allocation8 + $0x38] sm:$0xff]  ;;  %v1569_v15 = vld [vmem:[%s1994_s2] ss:$0 sm:$0xff]  ;;  %v1483_v20 = vld [vmem:[#allocation8 + $0x20] sm:$0xff] }
  0x53   : > { %793 = vmatpush.bf16.msra.mxu2 %v1440_v22  ;;  %v1484_v16 = vld [vmem:[#allocation8 + $0x28] sm:$0xff]  ;;  %v1482_v22 = vld [vmem:[#allocation8 + $0x18] sm:$0xff]  ;;  %p1715_p5 = pneg %p1714_p3 }
  0x54   : > { %806 = vmatpush.bf16.msra.mxu3 %v1448_v23 }
  0x55   : > { %768 = vmatpush.bf16.msra.mxu0 %v1423_v24  ;;  %p1720_p9 = pnand %p1719_p7, %p1715_p5 }
  0x56   : > { %781 = vmatpush.bf16.msra.mxu1 %v1431_v25  ;;  %v1481_v25 = vld [vmem:[#allocation8 + $0x10] sm:$0xff] }
  0x57   : > { %794 = vmatpush.bf16.msra.mxu2 %v1439_v26 }
  0x58   : > { %807 = vmatpush.bf16.msra.mxu3 %v1447_v28 }
  0x59   : > { %769 = vmatpush.bf16.msra.mxu0 %v1422_v27 }
  0x5a   : > { %782 = vmatpush.bf16.msra.mxu1 %v1430_v29 }
  0x5b   : > { %795 = vmatpush.bf16.msra.mxu2 %v1438_v34 }
  0x5c   : > { %770 = vmatmul.bf16.vlgmr.msra.gmra.mxu0 %v355_v36  ;;  %808 = vmatpush.bf16.msra.mxu3 %v1446_v38  ;;  %v1479_v38 = vld [vmem:[#allocation8] sm:$0xff] }
  0x5d   : > { %814 = vmatpush.bf16.msrb.mxu0 %v1461_v32  ;;  %783 = vmatmul.bf16.vlgmr.msra.gmra.mxu1 %v356_v37  ;;  %v1480_v37 = vld [vmem:[#allocation8 + $0x8] sm:$0xff] }
  0x5e   : > { %827 = vmatpush.bf16.msrb.mxu1 %v1469_v33  ;;  %796 = vmatmul.bf16.vlgmr.msra.gmra.mxu2 %v357_v43 }
  0x5f   : > { %847 = vmatpush.bf16.msrb.mxu2 %v1470_v39  ;;  %809 = vmatmul.bf16.vlgmr.msra.gmra.mxu3 %v358_v44  ;;  %v1570_v39 = vld [vmem:[%s1996_s4] ss:$0 sm:$0xff] }
  0x60   : > { %923 = vmatpush.bf16.msrb.mxu3 %v1478_v63 }
  0x61   : > { %815 = vmatpush.bf16.msrb.mxu0 %v1460_v41 }
  0x62   : > { %828 = vmatpush.bf16.msrb.mxu1 %v1468_v42 }
  0x63   : > { %1006 = vmatpush.bf16.msra.mxu2 %v1486_v11 }
  0x64   : > { %924 = vmatpush.bf16.msrb.mxu3 %v1477_v0 }
  0x65   : > { %816 = vmatpush.bf16.msrb.mxu0 %v1459_v45  ;;  %v1571_v45 = vld [vmem:[%s1998_s6] ss:$0 sm:$0xff] }
  0x66   : > { %829 = vmatpush.bf16.msrb.mxu1 %v1467_v46 }
  0x67   : > { %1007 = vmatpush.bf16.msra.mxu2 %v1485_v14 }
  0x68   : > { %925 = vmatpush.bf16.msrb.mxu3 %v1476_v1 }
  0x69   : > { %817 = vmatpush.bf16.msrb.mxu0 %v1458_v47 }
  0x6a   : > { %830 = vmatpush.bf16.msrb.mxu1 %v1466_v48 }
  0x6b   : > { %1008 = vmatpush.bf16.msra.mxu2 %v1484_v16 }
  0x6c   : > { %926 = vmatpush.bf16.msrb.mxu3 %v1475_v2 }
  0x6d   : > { %818 = vmatpush.bf16.msrb.mxu0 %v1457_v49 }
  0x6e   : > { %831 = vmatpush.bf16.msrb.mxu1 %v1465_v50  ;;  %1353 = vmatmul.msk.bf16.vlgmr.msrb.gmra.mxu2 %vm758_vm0, %v361_v54 }
  0x6f   : > { %1009 = vmatpush.bf16.msra.mxu2 %v1483_v20 }
  0x70   : > { %927 = vmatpush.bf16.msrb.mxu3 %v1474_v3 }
  0x71   : > { %819 = vmatpush.bf16.msrb.mxu0 %v1456_v52 }
  0x72   : > { %832 = vmatpush.bf16.msrb.mxu1 %v1464_v53 }
  0x73   : > { %1010 = vmatpush.bf16.msra.mxu2 %v1482_v22 }
  0x74   : > { %928 = vmatpush.bf16.msrb.mxu3 %v1473_v4 }
  0x75   : > { %820 = vmatpush.bf16.msrb.mxu0 %v1455_v55 }
  0x76   : > { %833 = vmatpush.bf16.msrb.mxu1 %v1463_v56 }
  0x77   : > { %1011 = vmatpush.bf16.msra.mxu2 %v1481_v25 }
  0x78   : > { %929 = vmatpush.bf16.msrb.mxu3 %v1472_v5 }
  0x79   : > { %821 = vmatpush.bf16.msrb.mxu0 %v1454_v57 }
  0x7a   : > { %834 = vmatpush.bf16.msrb.mxu1 %v1462_v58 }
  0x7b   : > { %1012 = vmatpush.bf16.msra.mxu2 %v1480_v37 }
  0x7c   : > { %822 = vmatmul.bf16.vlgmr.msrb.gmra.mxu0 %v359_v61  ;;  %930 = vmatpush.bf16.msrb.mxu3 %v1471_v8 }
  0x7d   : > { %835 = vmatmul.bf16.vlgmr.msrb.gmra.mxu1 %v360_v62 }
  0x7f   : > { %1013 = vmatpush.bf16.msra.mxu2 %v1479_v38 }
  0xd9   : > { %v771_v6 = vpop.f32.mrf.mxu0 }
  0xda   : > { %v784_v7 = vpop.f32.mrf.mxu1  ;;  %v772_v17 = vadd.f32 %v1569_v15, %v771_v6 }
  0xdc   : > { %v785_v21 = vadd.f32 %v784_v7, %v772_v17 }
  0xe1   : > { %v773_v9 = vpop.f32.mrf.mxu0  ;;  %v797_v12 = vpop.f32.mrf.mxu2 }
  0xe2   : > { %v786_v10 = vpop.f32.mrf.mxu1  ;;  %v810_v13 = vpop.f32.mrf.mxu3  ;;  %v798_v23 = vadd.f32 %v797_v12, %v785_v21 }
  0xe4   : > { %v811_v26 = vadd.f32 %v810_v13, %v798_v23 }
  0xe9   : > { %v799_v18 = vpop.f32.mrf.mxu2 }
  0xea   : > { %v812_v19 = vpop.f32.mrf.mxu3 }
  0xf1   : > { %v849_v24 = vpop.f32.mrf.mxu2 }
  0xf9   : > { %v823_v27 = vpop.f32.mrf.mxu0  ;;  %v851_v31 = vpop.f32.mrf.mxu2 }
  0xfa   : > { %v836_v28 = vpop.f32.mrf.mxu1  ;;  %v824_v29 = vadd.f32 %v823_v27, %v811_v26 }
  0xfc   : > { %v837_v30 = vadd.f32 %v836_v28, %v824_v29 }
  0xfe   : > { %v850_v32 = vadd.f32 %v849_v24, %v837_v30 }
 0x100   : > { %v853_v33 = vmax.f32 %v850_v32, 0.0 }
 0x101   : > { %v825_v34 = vpop.f32.mrf.mxu0 }
 0x102   : > { %v838_v35 = vpop.f32.mrf.mxu1  ;;  %v854_v36 = vpack.c.bf16 %v853_v33, %v853_v33 }
 0x104   : > { %931 = vmatmul.bf16.vlgmr.msrb.gmra.mxu3 %v854_v36 }
 0x187   : > { %v932_v40 = vpop.f32.mrf.mxu3 }
 0x188   : > { %v933_v41 = vadd.f32 %v1570_v39, %v932_v40 }
 0x18a   : > { %v936_v42 = vmax.f32 %v933_v41, 0.0 }
 0x18c   : > { %v937_v43 = vpack.c.bf16 %v936_v42, %v936_v42 }
 0x18e   : > { %1014 = vmatmul.bf16.vlgmr.msra.gmra.mxu2 %v937_v43 }
 0x18f   : > { %v934_v44 = vpop.f32.mrf.mxu3 }
 0x211   : > { %v1015_v46 = vpop.f32.mrf.mxu2 }
 0x212   : > { %v1016_v47 = vadd.f32 %v1571_v45, %v1015_v46 }
 0x214   : > { %1019 = vmax.xlane.f32.xlu0 %v1016_v47 }
 0x219   : > { %v1017_v48 = vpop.f32.mrf.mxu2 }
 0x287   : > { %v1020_v49 = vpop.xlane.xlu0 %1019 }
 0x288   : > { %v1021_v50 = vsub.f32 %v1016_v47, %v1020_v49 }
 0x28a   : > { %v1022_v51 = vmul.f32 1.442695, %v1021_v50 }
 0x28c   : > { %1572 = vpow2.f32 %v1022_v51 }
 0x292   : > { %v1573_v52 = vpop.eup %1572 }
 0x293   : > { %1024 = vadd.xlane.f32.xlu0 %v1573_v52 }
 0x306   : > { %v1025_v53 = vpop.xlane.xlu0 %1024 }
 0x307   : > { %1574 = vlog2.f32 %v1025_v53 }
 0x30d   : > { %v1575_v54 = vpop.eup %1574 }
 0x30e   : > { %v1027_v55 = vmul.f32 0.6931472, %v1575_v54 }
 0x310   : > { %v1028_v56 = vsub.f32 %v1021_v50, %v1027_v55 }
 0x312   : > { %1029 = vst [vmem:[%s346_s30] sm:$0xff] %v1028_v56 }
 0x313   : > { %1723 = shalt.err (!%p1720_p9)
}
 0x314   : > { %1504 = dma.vmem_to_hbm [thread:$0]  (%p1893_p0), %s1044_s20, 128, %s1046_s19, %s1031_s3  }
 0x315 PF: > { %s1057_s15 = sand.u32 1, %s1758_s24   ;;  %p2013_p10 = scmp.ge.s32.totalorder %s1770_s27, 2 }
 0x316   : > { %s1058_s18 = scalar_lea.sflag [#allocation4], %s1057_s15 }
 0x317   : > { %p1521_p11 = pnand %p2013_p10, %p1899_p6 }
 0x319   : > { %p1522_p12 = pneg %p1521_p11 }
 0x31b   : > { %1753 = dma.done.wait (%p1522_p12), %s1058_s18, 128  }
 0x31c   : > { %1755 = vsyncadd (%p1522_p12), %s1058_s18, 4294967168  ;;  %s2014_s21 = sld [smem:[#allocation15_spill]]  ;;  %p22_p2 = scmp.ge.s32.totalorder %s1873_s10, 4  }
 0x31d   : > { %s2015_s24 = smov %s1762_s25  ;;  %s2016_s25 = smov %s1766_s26 }
 0x31e   : > { %s2018_s27 = smov %s1873_s10  ;;  %24 = sbr.rel (!%p22_p2) target bundleno = 11 (0xb), region = 105 }
 0x322   : > { %s2017_s26 = smov %s2014_s21 }
 0x323   :  { %1064 = vsyncpa [#allocation3], 1 }
 0x324   :  { %1066 = vsyncpa [#allocation3 + $0x1], 1 }
 0x325   :  { %1067 = vsyncpa [#allocation6], 1 }
 0x326   :  { %1068 = vsyncpa [#allocation9], 1 }
 0x327   :  { %1069 = vsyncpa [#allocation4], 1 }
 0x328   :  { %1071 = vsyncpa [#allocation4 + $0x1], 1 }

</bundles_post_ra>
